<compile_context>
chip_gen: v5e
topology: v5e:2x2
jax: 0.10.0
libtpu: 0.0.40
codegen_flags: <defaults>
</compile_context>

<pallas_src>
import functools

import jax
import jax.numpy as jnp
from jax.experimental import pallas as pl
from jax.experimental.pallas import tpu as pltpu

_MIB = 1024 * 1024


def _round_up(x, m):
    return ((x + m - 1) // m) * m


def _hw_info():
    """Return (vmem_capacity_bytes, tensorcores_per_chip) with safe fallbacks."""
    vmem = None
    try:
        vmem = int(pltpu.get_tpu_info().vmem_capacity_bytes)
    except Exception:
        vmem = None
    kind = ""
    try:
        kind = jax.devices()[0].device_kind.lower()
    except Exception:
        kind = ""
    if vmem is None:
        if "v5 lite" in kind or "v5e" in kind or "v6" in kind:
            vmem = 128 * _MIB
        else:
            vmem = 64 * _MIB        # conservative: correct for v7x, safe everywhere
    cores = 2 if ("v7" in kind or "v4" in kind or "v5p" in kind) else 1
    return vmem, cores


def _mlp_kernel_resident(x_ref, w1_ref, b1_ref, w2_ref, b2_ref, o_ref):
    """Full weights VMEM-resident (constant index_maps): one row tile per step."""
    x = x_ref[...]
    h = jnp.dot(x, w1_ref[...], preferred_element_type=jnp.float32)
    h = jnp.maximum(h + b1_ref[...], 0.0)             # bias + ReLU in f32
    # TODO(synk): dropout is identity (eval mode); training-mode RNG not emulated.
    out = jnp.dot(h.astype(x.dtype), w2_ref[...],
                  preferred_element_type=jnp.float32)
    o_ref[...] = (out + b2_ref[...]).astype(o_ref.dtype)


def _mlp_kernel_streamed(x_ref, w1_ref, b1_ref, w2_ref, b2_ref, o_ref, acc_ref):
    """One (row-tile, d_ff-tile) step with a resident f32 accumulator."""
    k = pl.program_id(1)

    @pl.when(k == 0)
    def _init():
        # Fold b2 into the accumulator init (saves one full-tile VPU pass).
        acc_ref[...] = pl.broadcast_to(b2_ref[...], acc_ref.shape)

    x = x_ref[...]
    h = jnp.dot(x, w1_ref[...], preferred_element_type=jnp.float32)
    h = jnp.maximum(h + b1_ref[...], 0.0)              # bias + ReLU in f32
    # TODO(synk): dropout is identity (eval mode); training-mode RNG not emulated.
    acc_ref[...] += jnp.dot(h.astype(x.dtype), w2_ref[...],
                            preferred_element_type=jnp.float32)

    @pl.when(k == pl.num_programs(1) - 1)
    def _finalize():
        o_ref[...] = acc_ref[...].astype(o_ref.dtype)


@functools.partial(
    jax.jit,
    static_argnames=("tile_m", "tile_ff", "compute_dtype", "weights_resident"))
def mlp_pallas(x, w1, b1, w2, b2, *, tile_m=512, tile_ff=512,
               compute_dtype=None, weights_resident=None):
    """x: (..., d_model). w1: (d_model, d_ff), b1: (d_ff,), w2: (d_ff, d_model),
    b2: (d_model,).  Weights stored pre-transposed as (in_features, out_features).

    compute_dtype=None  -> bf16 MXU inputs + f32 accumulation when x is f32
                           (cast only the matmul operands; epilogue in f32).
    compute_dtype=jnp.float32 -> exact f32 path.
    weights_resident=None -> auto (resident if the full weights fit VMEM).
    """
    orig_shape = x.shape
    out_dtype = x.dtype
    d_model = orig_shape[-1]
    d_ff = w1.shape[1]

    # --- dtype policy: never hand mixed dtypes to the kernel ----------------
    if compute_dtype is None:
        cdt = jnp.dtype(jnp.bfloat16) if x.dtype == jnp.float32 else jnp.dtype(x.dtype)
    else:
        cdt = jnp.dtype(compute_dtype)
    x = x.astype(cdt)
    w1 = w1.astype(cdt)
    w2 = w2.astype(cdt)

    x2 = x.reshape(-1, d_model)
    m = x2.shape[0]

    vmem_bytes, n_cores = _hw_info()
    budget = int(vmem_bytes * 0.85)

    wb = cdt.itemsize
    ob = jnp.dtype(out_dtype).itemsize
    sub = 32 // wb                       # sublane minimum: 8 (f32) / 16 (bf16)

    # --- lane-dense padding (exact via zero padding) -------------------------
    d_model_p = _round_up(d_model, 128)
    d_ff_p = _round_up(d_ff, 128)

    # --- row tile: big for weight reuse; >=2 steps/core only on megacore ----
    tile_m = _round_up(max(tile_m, sub), sub)
    tile_m = min(tile_m, _round_up(m, sub))
    if n_cores > 1 and m >= 2 * n_cores * sub:
        tile_m = min(tile_m, _round_up(pl.cdiv(m, 2 * n_cores), sub))

    # --- d_ff tile for the streamed regime (multiple of 128, never one huge slab)
    tile_ff = min(_round_up(max(tile_ff, 128), 128), d_ff_p)

    # --- VMEM footprint / regime choice --------------------------------------
    def _resident_est(tm):
        w_bytes = 2 * d_model_p * d_ff_p * wb + (d_ff_p + d_model_p) * 4
        return 2 * (tm * d_model_p * (wb + ob)) + 2 * w_bytes

    def _streamed_est(tm, tff):
        return (2 * (tm * d_model_p * wb + d_model_p * tff * wb + tff * 4
                     + tff * d_model_p * wb + d_model_p * 4 + tm * d_model_p * ob)
                + tm * d_model_p * 4)

    if weights_resident is None:
        use_resident = _resident_est(tile_m) <= budget
    else:
        use_resident = bool(weights_resident)

    if use_resident:
        while _resident_est(tile_m) > budget and tile_m > sub:
            tile_m = max(sub, _round_up(tile_m // 2, sub))
        est = _resident_est(tile_m)
    else:
        while _streamed_est(tile_m, tile_ff) > budget and tile_ff > 128:
            tile_ff = max(128, _round_up(tile_ff // 2, 128))
        while _streamed_est(tile_m, tile_ff) > budget and tile_m > sub:
            tile_m = max(sub, _round_up(tile_m // 2, sub))
        d_ff_p = _round_up(d_ff_p, tile_ff)
        est = _streamed_est(tile_m, tile_ff)

    vmem_limit = int(min(vmem_bytes - 2 * _MIB, max(32 * _MIB, est * 5 // 4)))

    # --- pad operands ---------------------------------------------------------
    m_pad = _round_up(m, tile_m)
    x2 = jnp.pad(x2, ((0, m_pad - m), (0, d_model_p - d_model)))
    w1p = jnp.pad(w1, ((0, d_model_p - d_model), (0, d_ff_p - d_ff)))
    w2p = jnp.pad(w2, ((0, d_ff_p - d_ff), (0, d_model_p - d_model)))
    b1p = jnp.pad(b1.astype(jnp.float32), (0, d_ff_p - d_ff)).reshape(1, d_ff_p)
    b2p = jnp.pad(b2.astype(jnp.float32), (0, d_model_p - d_model)).reshape(1, d_model_p)

    if use_resident:
        out = pl.pallas_call(
            _mlp_kernel_resident,
            out_shape=jax.ShapeDtypeStruct((m_pad, d_model_p), out_dtype),
            grid_spec=pltpu.PrefetchScalarGridSpec(
                num_scalar_prefetch=0,
                grid=(m_pad // tile_m,),
                in_specs=[
                    pl.BlockSpec((tile_m, d_model_p), lambda i: (i, 0)),     # x
                    pl.BlockSpec((d_model_p, d_ff_p), lambda i: (0, 0)),     # W1 (resident)
                    pl.BlockSpec((1, d_ff_p), lambda i: (0, 0)),             # b1 (resident)
                    pl.BlockSpec((d_ff_p, d_model_p), lambda i: (0, 0)),     # W2 (resident)
                    pl.BlockSpec((1, d_model_p), lambda i: (0, 0)),          # b2 (resident)
                ],
                out_specs=pl.BlockSpec((tile_m, d_model_p), lambda i: (i, 0)),
            ),
            compiler_params=pltpu.CompilerParams(
                dimension_semantics=("parallel",),
                vmem_limit_bytes=vmem_limit,
            ),
        )(x2, w1p, b1p, w2p, b2p)
    else:
        # NOTE: if profiling shows exposed W1/W2 DMAs in this regime, the weight
        # BlockSpecs can take pipeline_mode=pl.Buffered(3) at the cost of VMEM.
        out = pl.pallas_call(
            _mlp_kernel_streamed,
            out_shape=jax.ShapeDtypeStruct((m_pad, d_model_p), out_dtype),
            grid_spec=pltpu.PrefetchScalarGridSpec(
                num_scalar_prefetch=0,
                grid=(m_pad // tile_m, d_ff_p // tile_ff),
                in_specs=[
                    pl.BlockSpec((tile_m, d_model_p), lambda i, k: (i, 0)),   # x
                    pl.BlockSpec((d_model_p, tile_ff), lambda i, k: (0, k)),  # W1 slab
                    pl.BlockSpec((1, tile_ff), lambda i, k: (0, k)),          # b1 slab
                    pl.BlockSpec((tile_ff, d_model_p), lambda i, k: (k, 0)),  # W2 slab
                    pl.BlockSpec((1, d_model_p), lambda i, k: (0, 0)),        # b2
                ],
                out_specs=pl.BlockSpec((tile_m, d_model_p), lambda i, k: (i, 0)),
                scratch_shapes=[pltpu.VMEM((tile_m, d_model_p), jnp.float32)],
            ),
            compiler_params=pltpu.CompilerParams(
                dimension_semantics=("parallel", "arbitrary"),
                vmem_limit_bytes=vmem_limit,
            ),
        )(x2, w1p, b1p, w2p, b2p)

    return out[:m, :d_model].reshape(orig_shape)


def init_mlp_params(key, d_model, dtype=jnp.float32):
    """Matches nn.Linear's U(-1/sqrt(fan_in), 1/sqrt(fan_in)) init."""
    d_ff = d_model * 2
    k1, k2, k3, k4 = jax.random.split(key, 4)
    bound1 = 1.0 / jnp.sqrt(d_model)
    bound2 = 1.0 / jnp.sqrt(d_ff)
    # Weights stored already transposed: (in_features, out_features).
    w1 = jax.random.uniform(k1, (d_model, d_ff), dtype, -bound1, bound1)
    b1 = jax.random.uniform(k2, (d_ff,), dtype, -bound1, bound1)
    w2 = jax.random.uniform(k3, (d_ff, d_model), dtype, -bound2, bound2)
    b2 = jax.random.uniform(k4, (d_model,), dtype, -bound2, bound2)
    return w1, b1, w2, b2


if __name__ == "__main__":
    key = jax.random.PRNGKey(0)
    k_x, k_p, k_x2, k_p2 = jax.random.split(key, 4)

    # Primary small shapes (resident-weights path; d_model 32 lane-padded to 128).
    batch, seq, d_model = 2, 8, 32
    x = jax.random.normal(k_x, (batch, seq, d_model), jnp.float32)
    w1, b1, w2, b2 = init_mlp_params(k_p, d_model)
    ref = jnp.maximum(x @ w1 + b1, 0.0) @ w2 + b2     # dropout = identity (eval)

    # Exact-f32 path (opt-in), tight tolerance.
    out_f32 = jax.block_until_ready(
        mlp_pallas(x, w1, b1, w2, b2, compute_dtype=jnp.float32))
    assert out_f32.shape == (batch, seq, d_model)
    assert jnp.allclose(out_f32, ref, atol=1e-5, rtol=1e-5), "f32 mismatch"

    # Default path: bf16 MXU inputs, f32 accumulation (intentional mixed precision).
    out_def = jax.block_until_ready(mlp_pallas(x, w1, b1, w2, b2))
    assert out_def.shape == (batch, seq, d_model)
    assert jnp.allclose(out_def.astype(jnp.float32), ref,
                        atol=1e-1, rtol=1e-1), "bf16 mismatch"

    # Forced streamed (d_ff-tiled accumulator) path with non-128-multiple dims
    # to exercise zero-padding + the multi-step reduction axis.
    d_model2 = 192
    x2 = jax.random.normal(k_x2, (batch, seq, d_model2), jnp.float32)
    w1b, b1b, w2b, b2b = init_mlp_params(k_p2, d_model2)
    ref2 = jnp.maximum(x2 @ w1b + b1b, 0.0) @ w2b + b2b
    out2 = jax.block_until_ready(
        mlp_pallas(x2, w1b, b1b, w2b, b2b, compute_dtype=jnp.float32,
                   tile_ff=128, weights_resident=False))
    assert out2.shape == (batch, seq, d_model2)
    assert jnp.allclose(out2, ref2, atol=1e-3, rtol=1e-3), "streamed mismatch"

    print("KERNEL_OK")
</pallas_src>

<mosaic_0001>
module attributes {stable_mosaic.version = 11 : i64} {
  func.func @_mlp_kernel_resident(%arg0: i32, %arg1: memref<16x128xf32, #tpu.memory_space<vmem>>, %arg2: memref<128x128xf32, #tpu.memory_space<vmem>>, %arg3: memref<1x128xf32, #tpu.memory_space<vmem>>, %arg4: memref<128x128xf32, #tpu.memory_space<vmem>>, %arg5: memref<1x128xf32, #tpu.memory_space<vmem>>, %arg6: memref<16x128xf32, #tpu.memory_space<vmem>>) attributes {dimension_semantics = [#tpu.dimension_semantics<parallel>], iteration_bounds = array<i64: 1>, scalar_prefetch = 0 : i64, scratch_operands = 0 : i64, tpu.core_type = #tpu.core_type<tc>, window_params = [{transform_indices = @transform_0, window_bounds = array<i64: 16, 128>}, {pipeline_mode = #tpu.pipeline_mode<synchronous>, transform_indices = @transform_1, window_bounds = array<i64: 128, 128>}, {pipeline_mode = #tpu.pipeline_mode<synchronous>, transform_indices = @transform_2, window_bounds = array<i64: 1, 128>}, {pipeline_mode = #tpu.pipeline_mode<synchronous>, transform_indices = @transform_3, window_bounds = array<i64: 128, 128>}, {pipeline_mode = #tpu.pipeline_mode<synchronous>, transform_indices = @transform_4, window_bounds = array<i64: 1, 128>}, {transform_indices = @transform_5, window_bounds = array<i64: 16, 128>}]} {
    %c0 = arith.constant 0 : index
    %c0_0 = arith.constant 0 : index
    %0 = vector.load %arg1[%c0, %c0_0] : memref<16x128xf32, #tpu.memory_space<vmem>>, vector<16x128xf32>
    %c0_1 = arith.constant 0 : index
    %c0_2 = arith.constant 0 : index
    %1 = vector.load %arg2[%c0_1, %c0_2] : memref<128x128xf32, #tpu.memory_space<vmem>>, vector<128x128xf32>
    %cst = arith.constant dense<0.000000e+00> : vector<16x128xf32>
    %2 = tpu.matmul %0, %1, %cst {dimension_numbers = #tpu.dot_dimension_numbers<[1], [0], [0], [1], [0, 0, 1, 1], [], []>} : vector<16x128xf32>, vector<128x128xf32>, vector<16x128xf32> -> vector<16x128xf32>
    %c0_3 = arith.constant 0 : index
    %c0_4 = arith.constant 0 : index
    %3 = vector.load %arg3[%c0_3, %c0_4] : memref<1x128xf32, #tpu.memory_space<vmem>>, vector<1x128xf32>
    %4 = vector.broadcast %3 : vector<1x128xf32> to vector<16x128xf32>
    %5 = arith.addf %2, %4 : vector<16x128xf32>
    %cst_5 = arith.constant 0.000000e+00 : f32
    %6 = vector.broadcast %cst_5 : f32 to vector<16x128xf32>
    %7 = arith.maximumf %5, %6 : vector<16x128xf32>
    %c0_6 = arith.constant 0 : index
    %c0_7 = arith.constant 0 : index
    %8 = vector.load %arg4[%c0_6, %c0_7] : memref<128x128xf32, #tpu.memory_space<vmem>>, vector<128x128xf32>
    %cst_8 = arith.constant dense<0.000000e+00> : vector<16x128xf32>
    %9 = tpu.matmul %7, %8, %cst_8 {dimension_numbers = #tpu.dot_dimension_numbers<[1], [0], [0], [1], [0, 0, 1, 1], [], []>} : vector<16x128xf32>, vector<128x128xf32>, vector<16x128xf32> -> vector<16x128xf32>
    %c0_9 = arith.constant 0 : index
    %c0_10 = arith.constant 0 : index
    %10 = vector.load %arg5[%c0_9, %c0_10] : memref<1x128xf32, #tpu.memory_space<vmem>>, vector<1x128xf32>
    %11 = vector.broadcast %10 : vector<1x128xf32> to vector<16x128xf32>
    %12 = arith.addf %9, %11 : vector<16x128xf32>
    %c0_11 = arith.constant 0 : index
    %c0_12 = arith.constant 0 : index
    %13 = vector.load %arg6[%c0_11, %c0_12] : memref<16x128xf32, #tpu.memory_space<vmem>>, vector<16x128xf32>
    tpu.vector_store %arg6[%c0_11, %c0_12], %12 {strides = array<i32>} : memref<16x128xf32, #tpu.memory_space<vmem>>, vector<16x128xf32>,
    return
  }
  func.func @transform_0(%arg0: i32) -> (i32, i32) {
    %c0_i32 = arith.constant 0 : i32
    %c0_i32_0 = arith.constant 0 : i32
    return %arg0, %c0_i32 : i32, i32
  }
  func.func @transform_1(%arg0: i32) -> (i32, i32) {
    %c0_i32 = arith.constant 0 : i32
    %c0_i32_0 = arith.constant 0 : i32
    %c0_i32_1 = arith.constant 0 : i32
    return %c0_i32, %c0_i32_0 : i32, i32
  }
  func.func @transform_2(%arg0: i32) -> (i32, i32) {
    %c0_i32 = arith.constant 0 : i32
    %c0_i32_0 = arith.constant 0 : i32
    %c0_i32_1 = arith.constant 0 : i32
    return %c0_i32, %c0_i32_0 : i32, i32
  }
  func.func @transform_3(%arg0: i32) -> (i32, i32) {
    %c0_i32 = arith.constant 0 : i32
    %c0_i32_0 = arith.constant 0 : i32
    %c0_i32_1 = arith.constant 0 : i32
    return %c0_i32, %c0_i32_0 : i32, i32
  }
  func.func @transform_4(%arg0: i32) -> (i32, i32) {
    %c0_i32 = arith.constant 0 : i32
    %c0_i32_0 = arith.constant 0 : i32
    %c0_i32_1 = arith.constant 0 : i32
    return %c0_i32, %c0_i32_0 : i32, i32
  }
  func.func @transform_5(%arg0: i32) -> (i32, i32) {
    %c0_i32 = arith.constant 0 : i32
    %c0_i32_0 = arith.constant 0 : i32
    return %arg0, %c0_i32 : i32, i32
  }
}

</mosaic_0001>

<bundles_post_ra>
// kernel: mlp_pallas.1
= control target key start
LH: loop header
LB: loop body
LE: loop exit
PB: predicated region body
PF: predicated region fallthrough
CT: control target
= control target key end

     0   :  { %s294_s1 = inlined_call_operand.vmem [shape: f32[128,128], index: 1, kind: input, shape index: {}]   ;;  %s295_s3 = inlined_call_operand.vmem [shape: f32[128,128], index: 3, kind: input, shape index: {}]   ;;  %s296_s2 = inlined_call_operand.vmem [shape: f32[1,128], index: 2, kind: input, shape index: {}]   ;;  %s297_s0 = inlined_call_operand.vmem [shape: f32[16,128], index: 0, kind: input, shape index: {}]   ;;  %s298_s4 = inlined_call_operand.vmem [shape: f32[1,128], index: 4, kind: input, shape index: {}]   ;;  %s299_s5 = inlined_call_operand.vmem [shape: f32[16,128], index: 5, kind: output, shape index: {}]  }
   0x1   :  { %v37_v0 = vld [vmem:[%s294_s1 + $0x78] sm:$0xff]  ;;  %v36_v1 = vld [vmem:[%s294_s1 + $0x70] sm:$0xff]  ;;  %v35_v2 = vld [vmem:[%s294_s1 + $0x68] sm:$0xff] }
   0x2   :  { %116 = vmatpush.msra.mxu2 %v37_v0  ;;  %42 = vmatpush.msra.mxu0 %v37_v0  ;;  %v34_v3 = vld [vmem:[%s294_s1 + $0x60] sm:$0xff]  ;;  %v33_v4 = vld [vmem:[%s294_s1 + $0x58] sm:$0xff]  ;;  %v81_v6 = vld [vmem:[%s295_s3 + $0x70] sm:$0xff] }
   0x3   :  { %v82_v5 = vld [vmem:[%s295_s3 + $0x78] sm:$0xff]  ;;  %v32_v7 = vld [vmem:[%s294_s1 + $0x50] sm:$0xff]  ;;  %v80_v8 = vld [vmem:[%s295_s3 + $0x68] sm:$0xff] }
   0x4   :  { %117 = vmatpush.msra.mxu2 %v36_v1  ;;  %43 = vmatpush.msra.mxu0 %v36_v1  ;;  %v31_v9 = vld [vmem:[%s294_s1 + $0x48] sm:$0xff]  ;;  %v79_v10 = vld [vmem:[%s295_s3 + $0x60] sm:$0xff]  ;;  %v78_v12 = vld [vmem:[%s295_s3 + $0x58] sm:$0xff] }
   0x5   :  { %132 = vmatpush.msra.mxu3 %v82_v5  ;;  %87 = vmatpush.msra.mxu1 %v82_v5  ;;  %v30_v11 = vld [vmem:[%s294_s1 + $0x40] sm:$0xff]  ;;  %v29_v13 = vld [vmem:[%s294_s1 + $0x38] sm:$0xff]  ;;  %v77_v14 = vld [vmem:[%s295_s3 + $0x50] sm:$0xff] }
   0x6   :  { %118 = vmatpush.msra.mxu2 %v35_v2  ;;  %44 = vmatpush.msra.mxu0 %v35_v2  ;;  %v28_v15 = vld [vmem:[%s294_s1 + $0x30] sm:$0xff]  ;;  %v76_v16 = vld [vmem:[%s295_s3 + $0x48] sm:$0xff]  ;;  %v75_v18 = vld [vmem:[%s295_s3 + $0x40] sm:$0xff] }
   0x7   :  { %133 = vmatpush.msra.mxu3 %v81_v6  ;;  %88 = vmatpush.msra.mxu1 %v81_v6  ;;  %v27_v17 = vld [vmem:[%s294_s1 + $0x28] sm:$0xff]  ;;  %v26_v19 = vld [vmem:[%s294_s1 + $0x20] sm:$0xff]  ;;  %v74_v20 = vld [vmem:[%s295_s3 + $0x38] sm:$0xff] }
   0x8   :  { %119 = vmatpush.msra.mxu2 %v34_v3  ;;  %45 = vmatpush.msra.mxu0 %v34_v3  ;;  %v25_v21 = vld [vmem:[%s294_s1 + $0x18] sm:$0xff]  ;;  %v73_v22 = vld [vmem:[%s295_s3 + $0x30] sm:$0xff]  ;;  %v72_v24 = vld [vmem:[%s295_s3 + $0x28] sm:$0xff] }
   0x9   :  { %134 = vmatpush.msra.mxu3 %v80_v8  ;;  %89 = vmatpush.msra.mxu1 %v80_v8  ;;  %v24_v23 = vld [vmem:[%s294_s1 + $0x10] sm:$0xff]  ;;  %v23_v25 = vld [vmem:[%s294_s1 + $0x8] sm:$0xff]  ;;  %v71_v26 = vld [vmem:[%s295_s3 + $0x20] sm:$0xff] }
   0xa   :  { %120 = vmatpush.msra.mxu2 %v33_v4  ;;  %46 = vmatpush.msra.mxu0 %v33_v4  ;;  %v22_v27 = vld [vmem:[%s294_s1] sm:$0xff]  ;;  %v21_v28 = vld [vmem:[%s297_s0 + $0x8] sm:$0xff]  ;;  %v70_v30 = vld [vmem:[%s295_s3 + $0x18] sm:$0xff] }
   0xb   :  { %135 = vmatpush.msra.mxu3 %v79_v10  ;;  %90 = vmatpush.msra.mxu1 %v79_v10  ;;  %v20_v29 = vld [vmem:[%s297_s0] sm:$0xff]  ;;  %v69_v31 = vld [vmem:[%s295_s3 + $0x10] sm:$0xff]  ;;  %v68_v32 = vld [vmem:[%s295_s3 + $0x8] sm:$0xff] }
   0xc   :  { %121 = vmatpush.msra.mxu2 %v32_v7  ;;  %47 = vmatpush.msra.mxu0 %v32_v7  ;;  %v67_v33 = vld [vmem:[%s295_s3] sm:$0xff] }
   0xd   :  { %136 = vmatpush.msra.mxu3 %v78_v12  ;;  %91 = vmatpush.msra.mxu1 %v78_v12  ;;  %v148_v34 = vld [vmem:[%s296_s2] ss:$0 sm:$0xff] }
   0xe   :  { %122 = vmatpush.msra.mxu2 %v31_v9  ;;  %48 = vmatpush.msra.mxu0 %v31_v9  ;;  %v149_v41 = vld [vmem:[%s298_s4] ss:$0 sm:$0xff] }
   0xf   :  { %137 = vmatpush.msra.mxu3 %v77_v14  ;;  %92 = vmatpush.msra.mxu1 %v77_v14 }
  0x10   :  { %123 = vmatpush.msra.mxu2 %v30_v11  ;;  %49 = vmatpush.msra.mxu0 %v30_v11 }
  0x11   :  { %138 = vmatpush.msra.mxu3 %v76_v16  ;;  %93 = vmatpush.msra.mxu1 %v76_v16 }
  0x12   :  { %124 = vmatpush.msra.mxu2 %v29_v13  ;;  %50 = vmatpush.msra.mxu0 %v29_v13 }
  0x13   :  { %139 = vmatpush.msra.mxu3 %v75_v18  ;;  %94 = vmatpush.msra.mxu1 %v75_v18 }
  0x14   :  { %125 = vmatpush.msra.mxu2 %v28_v15  ;;  %51 = vmatpush.msra.mxu0 %v28_v15 }
  0x15   :  { %140 = vmatpush.msra.mxu3 %v74_v20  ;;  %95 = vmatpush.msra.mxu1 %v74_v20 }
  0x16   :  { %126 = vmatpush.msra.mxu2 %v27_v17  ;;  %52 = vmatpush.msra.mxu0 %v27_v17 }
  0x17   :  { %141 = vmatpush.msra.mxu3 %v73_v22  ;;  %96 = vmatpush.msra.mxu1 %v73_v22 }
  0x18   :  { %127 = vmatpush.msra.mxu2 %v26_v19  ;;  %53 = vmatpush.msra.mxu0 %v26_v19 }
  0x19   :  { %142 = vmatpush.msra.mxu3 %v72_v24  ;;  %97 = vmatpush.msra.mxu1 %v72_v24 }
  0x1a   :  { %128 = vmatpush.msra.mxu2 %v25_v21  ;;  %54 = vmatpush.msra.mxu0 %v25_v21 }
  0x1b   :  { %143 = vmatpush.msra.mxu3 %v71_v26  ;;  %98 = vmatpush.msra.mxu1 %v71_v26 }
  0x1c   :  { %129 = vmatpush.msra.mxu2 %v24_v23  ;;  %55 = vmatpush.msra.mxu0 %v24_v23 }
  0x1d   :  { %144 = vmatpush.msra.mxu3 %v70_v30  ;;  %99 = vmatpush.msra.mxu1 %v70_v30 }
  0x1e   :  { %130 = vmatpush.msra.mxu2 %v23_v25  ;;  %56 = vmatpush.msra.mxu0 %v23_v25 }
  0x1f   :  { %145 = vmatpush.msra.mxu3 %v69_v31  ;;  %100 = vmatpush.msra.mxu1 %v69_v31 }
  0x20   :  { %131 = vmatpush.msra.mxu2 %v22_v27  ;;  %57 = vmatpush.msra.mxu0 %v22_v27 }
  0x21   :  { %61 = vmatmul.f32.vlgmr.msra.gmra.mxu2 %v21_v28  ;;  %58 = vmatmul.f32.vlgmr.msra.gmra.mxu0 %v20_v29 }
  0x22   :  { %146 = vmatpush.msra.mxu3 %v68_v32  ;;  %101 = vmatpush.msra.mxu1 %v68_v32 }
  0x24   :  { %147 = vmatpush.msra.mxu3 %v67_v33  ;;  %102 = vmatpush.msra.mxu1 %v67_v33 }
  0x9e   :  { %v59_v35 = vpop.f32.mrf.mxu0 }
  0x9f   :  { %v60_v36 = vadd.f32 %v148_v34, %v59_v35 }
  0xa1   :  { %v65_v37 = vmax.f32 %v60_v36, 0.0 }
  0xa3   :  { %103 = vmatmul.f32.vlgmr.msra.gmra.mxu1 %v65_v37 }
  0xa4   :  { %v62_v38 = vpop.f32.mrf.mxu2 }
  0xa5   :  { %v63_v39 = vadd.f32 %v148_v34, %v62_v38 }
  0xa7   :  { %v66_v40 = vmax.f32 %v63_v39, 0.0 }
  0xa9   :  { %106 = vmatmul.f32.vlgmr.msra.gmra.mxu3 %v66_v40 }
 0x120   :  { %v104_v42 = vpop.f32.mrf.mxu1 }
 0x121   :  { %v105_v43 = vadd.f32 %v149_v41, %v104_v42 }
 0x123   :  { %110 = vst [vmem:[%s299_s5] sm:$0xff] %v105_v43 }
 0x12c   :  { %v107_v44 = vpop.f32.mrf.mxu3 }
 0x12d   :  { %v108_v45 = vadd.f32 %v149_v41, %v107_v44 }
 0x12f   :  { %111 = vst [vmem:[%s299_s5 + $0x8] sm:$0xff] %v108_v45 }

</bundles_post_ra>
